<compile_context>
chip_gen: v7x
topology: tpu7x:2x2x1
jax: 0.10.0
libtpu: 0.0.40
codegen_flags: <defaults>
</compile_context>

<pallas_src>
import jax
import jax.numpy as jnp
from jax.experimental import pallas as pl
from jax.experimental.pallas import tpu as pltpu


def nlinear_kernel(x_ref, w_ref, b_ref, o_ref):
    # x_ref: (TR, S)  rows = flattened (batch, channel), seq on the lane axis
    # w_ref: (S, P)   MXU-native (K, N) weight layout, resident across the grid
    # b_ref: (1, P)   Linear bias, resident
    # o_ref: (TR, P)  lane-dense output tile
    S = x_ref.shape[1]
    seq_last = x_ref[:, S - 1:S]                       # (TR, 1) last time step per row
    xc = x_ref[...] - seq_last                         # normalize
    y = jnp.dot(xc, w_ref[...], preferred_element_type=jnp.float32)   # (TR, P) on MXU
    o_ref[...] = (y + b_ref[...] + seq_last).astype(o_ref.dtype)      # bias + de-normalize


def nlinear_forward(x, weight, bias, *, row_tile=512):
    """x: [B, 1, C, S] float32; weight: [P, S]; bias: [P] -> out: [B, P, 3]"""
    B, one, C, S = x.shape
    assert one == 1, "expected a size-1 second dim (squeeze(1) in the module)"
    assert C >= 3, "NLinear keeps the first 3 channels; need C >= 3"
    P = weight.shape[0]
    keep = 3

    R = B * C
    # Free reshape (no copy): drops the size-1 dim and folds (B, C) into rows.
    x_rows = x.reshape(R, S)
    # One-time, tiny, cacheable transpose outside the hot loop -> (K, N) layout.
    w_t = jnp.transpose(weight)                       # (S, P)
    b2 = bias.reshape(1, P)

    # Row tile: full extent if small, else 512 (multiple of 8 -> (8,128)-legal;
    # a partial last block is padded/masked by Pallas).
    tr = R if R <= row_tile else row_tile
    grid = (pl.cdiv(R, tr),)

    cost = pl.CostEstimate(
        flops=2 * R * S * P,
        transcendentals=0,
        bytes_accessed=4 * (R * S + S * P + P + R * P),
    )

    out = pl.pallas_call(
        nlinear_kernel,
        out_shape=jax.ShapeDtypeStruct((R, P), x.dtype),
        grid_spec=pl.GridSpec(
            grid=grid,
            in_specs=[
                pl.BlockSpec((tr, S), lambda i: (i, 0)),   # streamed row tiles
                pl.BlockSpec((S, P), lambda i: (0, 0)),    # resident weight
                pl.BlockSpec((1, P), lambda i: (0, 0)),    # resident bias
            ],
            out_specs=pl.BlockSpec((tr, P), lambda i: (i, 0)),
        ),
        compiler_params=pltpu.CompilerParams(
            dimension_semantics=("parallel",)),            # v7x megacore sharding
        cost_estimate=cost,
    )(x_rows, w_t, b2)                                     # (B*C, P)

    # Small output-side glue: keep first 3 channels, lay out as [B, P, 3].
    return jnp.transpose(out.reshape(B, C, P)[:, :keep, :], (0, 2, 1))


def nlinear_reference(x, weight, bias):
    """Pure-JAX reference mirroring the PyTorch forward exactly."""
    x = x[:, 0]                          # squeeze(1): [B, C, S]
    x = jnp.transpose(x, (0, 2, 1))      # [B, S, C]
    seq_last = x[:, -1:, :]              # [B, 1, C]
    x = x - seq_last
    x = jnp.transpose(x, (0, 2, 1))      # [B, C, S]
    x = jnp.einsum("bcs,ps->bcp", x, weight) + bias   # [B, C, P]
    x = jnp.transpose(x, (0, 2, 1))      # [B, P, C]
    x = x + seq_last
    return x[:, :, :3]


if __name__ == "__main__":
    B, C, SEQ_LEN, PRED_LEN = 2, 4, 16, 24

    key = jax.random.PRNGKey(0)
    kx, kw, kb = jax.random.split(key, 3)

    x = jax.random.normal(kx, (B, 1, C, SEQ_LEN), dtype=jnp.float32)
    # Deterministic nn.Linear-style init: U(-1/sqrt(in), 1/sqrt(in))
    bound = 1.0 / (SEQ_LEN ** 0.5)
    weight = jax.random.uniform(kw, (PRED_LEN, SEQ_LEN), jnp.float32, -bound, bound)
    bias = jax.random.uniform(kb, (PRED_LEN,), jnp.float32, -bound, bound)

    fwd = jax.jit(nlinear_forward)
    out = jax.block_until_ready(fwd(x, weight, bias))

    ref = nlinear_reference(x, weight, bias)
    assert out.shape == (B, PRED_LEN, 3), out.shape
    assert jnp.allclose(out, ref, atol=1e-5, rtol=1e-5), "mismatch vs reference"

    print("KERNEL_OK")
</pallas_src>

<mosaic_0001>
module attributes {stable_mosaic.version = 11 : i64} {
  func.func @nlinear_kernel(%arg0: i32, %arg1: memref<8x16xf32, #tpu.memory_space<vmem>>, %arg2: memref<16x24xf32, #tpu.memory_space<vmem>>, %arg3: memref<1x24xf32, #tpu.memory_space<vmem>>, %arg4: memref<8x24xf32, #tpu.memory_space<vmem>>) attributes {dimension_semantics = [#tpu.dimension_semantics<parallel>], iteration_bounds = array<i64: 1>, scalar_prefetch = 0 : i64, scratch_operands = 0 : i64, tpu.core_type = #tpu.core_type<tc>, window_params = [{transform_indices = @transform_0, window_bounds = array<i64: 8, 16>}, {pipeline_mode = #tpu.pipeline_mode<synchronous>, transform_indices = @transform_1, window_bounds = array<i64: 16, 24>}, {pipeline_mode = #tpu.pipeline_mode<synchronous>, transform_indices = @transform_2, window_bounds = array<i64: 1, 24>}, {transform_indices = @transform_3, window_bounds = array<i64: 8, 24>}]} {
    %c0 = arith.constant 0 : index
    %c15 = arith.constant 15 : index
    %0 = vector.load %arg1[%c0, %c15] : memref<8x16xf32, #tpu.memory_space<vmem>>, vector<8x1xf32>
    %c0_0 = arith.constant 0 : index
    %c0_1 = arith.constant 0 : index
    %1 = vector.load %arg1[%c0_0, %c0_1] : memref<8x16xf32, #tpu.memory_space<vmem>>, vector<8x16xf32>
    %2 = vector.broadcast %0 : vector<8x1xf32> to vector<8x16xf32>
    %3 = arith.subf %1, %2 : vector<8x16xf32>
    %c0_2 = arith.constant 0 : index
    %c0_3 = arith.constant 0 : index
    %4 = vector.load %arg2[%c0_2, %c0_3] : memref<16x24xf32, #tpu.memory_space<vmem>>, vector<16x24xf32>
    %cst = arith.constant dense<0.000000e+00> : vector<8x24xf32>
    %5 = tpu.matmul %3, %4, %cst {dimension_numbers = #tpu.dot_dimension_numbers<[1], [0], [0], [1], [0, 0, 1, 1], [], []>} : vector<8x16xf32>, vector<16x24xf32>, vector<8x24xf32> -> vector<8x24xf32>
    %c0_4 = arith.constant 0 : index
    %c0_5 = arith.constant 0 : index
    %6 = vector.load %arg3[%c0_4, %c0_5] : memref<1x24xf32, #tpu.memory_space<vmem>>, vector<1x24xf32>
    %7 = vector.broadcast %6 : vector<1x24xf32> to vector<8x24xf32>
    %8 = arith.addf %5, %7 : vector<8x24xf32>
    %9 = vector.broadcast %0 : vector<8x1xf32> to vector<8x24xf32>
    %10 = arith.addf %8, %9 : vector<8x24xf32>
    %c0_6 = arith.constant 0 : index
    %c0_7 = arith.constant 0 : index
    %11 = vector.load %arg4[%c0_6, %c0_7] : memref<8x24xf32, #tpu.memory_space<vmem>>, vector<8x24xf32>
    tpu.vector_store %arg4[%c0_6, %c0_7], %10 {strides = array<i32>} : memref<8x24xf32, #tpu.memory_space<vmem>>, vector<8x24xf32>,
    return
  }
  func.func @transform_0(%arg0: i32) -> (i32, i32) {
    %c0_i32 = arith.constant 0 : i32
    %c0_i32_0 = arith.constant 0 : i32
    return %arg0, %c0_i32 : i32, i32
  }
  func.func @transform_1(%arg0: i32) -> (i32, i32) {
    %c0_i32 = arith.constant 0 : i32
    %c0_i32_0 = arith.constant 0 : i32
    %c0_i32_1 = arith.constant 0 : i32
    return %c0_i32, %c0_i32_0 : i32, i32
  }
  func.func @transform_2(%arg0: i32) -> (i32, i32) {
    %c0_i32 = arith.constant 0 : i32
    %c0_i32_0 = arith.constant 0 : i32
    %c0_i32_1 = arith.constant 0 : i32
    return %c0_i32, %c0_i32_0 : i32, i32
  }
  func.func @transform_3(%arg0: i32) -> (i32, i32) {
    %c0_i32 = arith.constant 0 : i32
    %c0_i32_0 = arith.constant 0 : i32
    return %arg0, %c0_i32 : i32, i32
  }
}

</mosaic_0001>

<bundles_post_ra>
// kernel: nlinear_forward.1
= control target key start
LH: loop header
LB: loop body
LE: loop exit
PB: predicated region body
PF: predicated region fallthrough
CT: control target
= control target key end

     0   :  { %8 = vsyncpa [#allocation3], 0  ;;  %s173_s12 = smov [#allocation2]   ;;  %s221_s0 = inlined_call_operand.vmem [shape: f32[8,16], index: 0, kind: input, shape index: {}]   ;;  %s222_s1 = inlined_call_operand.hbm [shape: f32[16,24], index: 1, kind: input, shape index: {}]   ;;  %s223_s2 = inlined_call_operand.vmem [shape: f32[1,24], index: 2, kind: input, shape index: {}]   ;;  %s224_s3 = inlined_call_operand.vmem [shape: f32[8,24], index: 3, kind: output, shape index: {}]  }
   0x1   :  { %s16_s13 = sshll.u32 %s173_s12, 4  ;;  %s149_s16 = scalar_lea.hbm %s222_s1, 256  ;;  %s17_s13 = int_to_ptr.vmem [resolvable:$true] %s16_s13 }
   0x2   :  { %p150_p0 = scmp.ne.s32.totalorder %s222_s1, %s149_s16  ;;  %p153_p1 = scmp.lt.u32.totalorder %s149_s16, %s222_s1 }
   0x4   :  { %p155_p2 = pnand %p153_p1, %p150_p0 }
   0x6   :  { %158 = shalt.err (!%p155_p2)
}
   0x7   :  { %s159_s21 = scalar_lea.vmem %s17_s13, 256  ;;  %p164_p4 = scmp.lt.s32.totalorder %s17_s13, %s17_s13 }
   0x8   :  { %p160_p3 = scmp.ne.s32.totalorder %s17_s13, %s159_s21  ;;  %p165_p5 = scmp.lt.s32.totalorder %s159_s21, %s159_s21 }
   0xa   :  { %p166_p6 = por %p165_p5, %p164_p4 }
   0xc   :  { %p167_p7 = pnand %p166_p6, %p160_p3 }
   0xe   :  { %170 = shalt.err (!%p167_p7)
}
   0xf   :  { %s174_s22 = smov 128   ;;  %s175_s23 = smov 8  }
  0x10   :  { %22 = dma.hbm_to_vmem [thread:$0]  %s222_s1, 256, %s17_s13, [#allocation3], %s174_s22, %s174_s22, %s175_s23  }
  0x11   :  { %171 = dma.done.wait [#allocation3], 256  }
  0x12   :  { %172 = vsyncadd [#allocation3], 4294967040  ;;  %v176_v0 = vmov 15   ;;  %v177_v1 = vmov 0.0|0.0   ;;  %v28_v2 = vld [vmem:[%s221_s0] sm:$0xff]  ;;  %v36_v4 = vld [vmem:[#allocation2 + $0x8] sm:$0xff] }
  0x13   :  { %148 = vset.pattern.permute.xlu0 %v176_v0  ;;  %138 = vmatprep.subr.bf16.mxu0 %v177_v1  ;;  %v35_v3 = vld [vmem:[#allocation2] sm:$0xff]  ;;  %vm178_vm0 = vmmov 0   ;;  %v179_v6 = vmov 0.0   ;;  %vm44_vm1 = vcmask 130048   ;;  %vm119_vm2 = vcmask 195584  }
  0x14   :  { %31 = vperm.xlu0 %148, %v28_v2   ;;  %v139_v5 = vpack.c.bf16 %v36_v4, %v35_v3  ;;  %135 = vmatprep.mubr.msk.f32.mxu0 %vm178_vm0, %v179_v6  ;;  %v126_v9 = vld [vmem:[%s223_s2] ss:$0 sm:$0xff] }
  0x16   :  { %140 = vmatpush3.bf16.msra.mxu0 %v139_v5 }
  0x93   :  { %v32_v7 = vpop.permute.xlu0 %31 }
  0x94   :  { %v34_v8 = vsub.f32 %v28_v2, %v32_v7 }
  0x96   :  { %136 = vmatmul.mubr.msk.f32.vlgmr.msra.gmra.mrb[0].mxu0 %vm44_vm1, %v34_v8 }
 0x169   :  { %v114_v10 = vpop.f32.mrb[0].mxu0 }
 0x16a   :  { %v115_v11 = vadd.f32 %v126_v9, %v114_v10  ;;  %v137_v12 = vpop.f32.mrb[1].mxu0 }
 0x16c   :  { %v118_v13 = vadd.f32 %v115_v11, %v32_v7 }
 0x16e   :  { %120 = vst.msk [vmem:[%s224_s3] sm:$0xff] %vm119_vm2, %v118_v13 }
 0x16f   :  { %125 = vsyncpa [#allocation3], 1 }

</bundles_post_ra>
